<compile_context>
chip_gen: v5e
topology: v5e:2x2
jax: 0.10.0
libtpu: 0.0.40
codegen_flags: <defaults>
</compile_context>

<pallas_src>
import jax
import jax.numpy as jnp
from jax.experimental import pallas as pl
from jax.experimental.pallas import tpu as pltpu

NUM_COUPLING_LAYERS = 3
NUM_NET_LAYERS = 6                       # linears per coupling MLP
NUM_HIDDEN_LINEARS = NUM_NET_LAYERS - 2  # 4 hidden (H,H) linears
LEAKY_SLOPE = 0.2


def _round_up(n, m):
    return ((n + m - 1) // m) * m


def _nice_kernel(x_ref, scale_ref, w_in_ref, b_in_ref, w_hid_ref, b_hid_ref,
                 w_out_ref, b_out_ref, z_ref, ll_ref):
    """One batch tile of the NICE forward.  Weights are mask-folded bf16; biases f32."""
    z = x_ref[...].astype(jnp.float32)                               # (TB, D)

    # --- coupling layers (masks folded into w_in / w_out / b_out; log-det = 0) ---
    for i in range(NUM_COUPLING_LAYERS):
        h = jnp.dot(z.astype(jnp.bfloat16), w_in_ref[i],
                    preferred_element_type=jnp.float32) + b_in_ref[i]
        h = jnp.where(h > 0, h, LEAKY_SLOPE * h)                     # LeakyReLU(0.2), f32
        for j in range(NUM_HIDDEN_LINEARS):
            h = jnp.dot(h.astype(jnp.bfloat16), w_hid_ref[i, j],
                        preferred_element_type=jnp.float32) + b_hid_ref[i, j]
            h = jnp.where(h > 0, h, LEAKY_SLOPE * h)
        # m_out is already zero on the masked half (folded weights/bias).
        z = z + jnp.dot(h.astype(jnp.bfloat16), w_out_ref[i],
                        preferred_element_type=jnp.float32) + b_out_ref[i]

    # --- scaling layer (exp(log_scale) precomputed in the wrapper) ---
    z = scale_ref[...] * z                                           # (1,D)*(TB,D)

    # --- logistic prior:  -(softplus(z)+softplus(-z)) == -(|z| + 2*softplus(-|z|)) ---
    a = jnp.abs(z)
    log_prob = -(a + 2.0 * jax.nn.softplus(-a))                      # (TB, D)

    z_ref[...] = z.astype(z_ref.dtype)
    # TODO(synk): (TB,1) output is a masked (1-lane) store; lane-dense ll layout would
    # need a sublane->lane relayout and is negligible next to the (TB,D) z store here.
    ll_ref[...] = jnp.sum(log_prob, axis=1, keepdims=True).astype(ll_ref.dtype)


@jax.jit
def nice_forward(x, masks, w_in, b_in, w_hid, b_hid, w_out, b_out, log_scale):
    B, D = x.shape
    H = w_in.shape[-1]

    # ---- fold coupling masks into the weights (exact: masks are 0/1) ----
    inv_mask = 1.0 - masks                                           # (3, D)
    w_in_f = (masks[:, :, None] * w_in).astype(jnp.bfloat16)         # (3, D, H)
    w_hid_f = w_hid.astype(jnp.bfloat16)                             # (3, 4, H, H)
    w_out_f = (w_out * inv_mask[:, None, :]).astype(jnp.bfloat16)    # (3, H, D)
    b_out_f = (inv_mask * b_out).astype(jnp.float32)                 # (3, D)
    scale = jnp.exp(log_scale).astype(jnp.float32)                   # (1, D), hoisted
    log_det = jnp.sum(log_scale)                                     # scalar, hoisted

    # ---- batch tiling ----
    TB = min(256, _round_up(max(B, 8), 8))
    B_pad = _round_up(B, TB)
    if B_pad != B:
        x = jnp.pad(x, ((0, B_pad - B), (0, 0)))
    grid = (B_pad // TB,)

    # ---- explicit VMEM budget: 2x (double-buffered) weights + tiles, capped at v7x 64MiB ----
    weight_bytes = 2 * (w_in_f.size + w_hid_f.size + w_out_f.size)   # bf16
    small_bytes = 4 * (b_in.size + b_hid.size + b_out_f.size + scale.size)
    act_bytes = 4 * TB * (2 * D + 2 * max(D, H) + 2)
    vmem_limit = int(min(max(2 * (weight_bytes + small_bytes) + 4 * act_bytes + (4 << 20),
                             32 << 20),
                         64 << 20))

    z_pad, ll_pad = pl.pallas_call(
        _nice_kernel,
        grid=grid,
        in_specs=[
            pl.BlockSpec((TB, D), lambda i: (i, 0)),                                  # x tile
            pl.BlockSpec((1, D), lambda i: (0, 0)),                                   # exp(log_scale)
            pl.BlockSpec((NUM_COUPLING_LAYERS, D, H), lambda i: (0, 0, 0)),           # w_in
            pl.BlockSpec((NUM_COUPLING_LAYERS, H), lambda i: (0, 0)),                 # b_in
            pl.BlockSpec((NUM_COUPLING_LAYERS, NUM_HIDDEN_LINEARS, H, H),
                         lambda i: (0, 0, 0, 0)),                                     # w_hid
            pl.BlockSpec((NUM_COUPLING_LAYERS, NUM_HIDDEN_LINEARS, H),
                         lambda i: (0, 0, 0)),                                        # b_hid
            pl.BlockSpec((NUM_COUPLING_LAYERS, H, D), lambda i: (0, 0, 0)),           # w_out
            pl.BlockSpec((NUM_COUPLING_LAYERS, D), lambda i: (0, 0)),                 # b_out
        ],
        out_specs=(pl.BlockSpec((TB, D), lambda i: (i, 0)),
                   pl.BlockSpec((TB, 1), lambda i: (i, 0))),
        out_shape=(jax.ShapeDtypeStruct((B_pad, D), jnp.float32),
                   jax.ShapeDtypeStruct((B_pad, 1), jnp.float32)),
        compiler_params=pltpu.CompilerParams(
            dimension_semantics=("parallel",),
            vmem_limit_bytes=vmem_limit),
    )(x, scale, w_in_f, b_in, w_hid_f, b_hid, w_out_f, b_out_f)

    return z_pad[:B], ll_pad[:B, 0] + log_det


# ----------------------------- parameter setup -----------------------------

def make_masks(data_dim):
    base = jnp.zeros((data_dim,), jnp.float32).at[::2].set(1.0)      # [1,0,1,0,...]
    masks = []
    for i in range(NUM_COUPLING_LAYERS):
        orientation = (i % 2 == 0)
        masks.append(1.0 - base if orientation else base)
    return jnp.stack(masks, axis=0)                                  # (num_coupling, D)


def init_params(key, data_dim, hidden_dim):
    """Deterministic PyTorch-Linear-style init; weights stored as (in, out)."""
    def linear(key, fan_in, fan_out):
        k = 1.0 / jnp.sqrt(fan_in)
        kw, kb = jax.random.split(key)
        w = jax.random.uniform(kw, (fan_in, fan_out), jnp.float32, -k, k)
        b = jax.random.uniform(kb, (fan_out,), jnp.float32, -k, k)
        return w, b

    keys = jax.random.split(key, NUM_COUPLING_LAYERS * NUM_NET_LAYERS + 1)
    w_in, b_in, w_hid, b_hid, w_out, b_out = [], [], [], [], [], []
    ki = 0
    for _ in range(NUM_COUPLING_LAYERS):
        w, b = linear(keys[ki], data_dim, hidden_dim); ki += 1
        w_in.append(w); b_in.append(b)
        whs, bhs = [], []
        for _ in range(NUM_HIDDEN_LINEARS):
            w, b = linear(keys[ki], hidden_dim, hidden_dim); ki += 1
            whs.append(w); bhs.append(b)
        w_hid.append(jnp.stack(whs)); b_hid.append(jnp.stack(bhs))
        w, b = linear(keys[ki], hidden_dim, data_dim); ki += 1
        w_out.append(w); b_out.append(b)
    log_scale = jax.random.normal(keys[ki], (1, data_dim), jnp.float32)
    return (jnp.stack(w_in), jnp.stack(b_in),
            jnp.stack(w_hid), jnp.stack(b_hid),
            jnp.stack(w_out), jnp.stack(b_out),
            log_scale)


# ---------------------------- pure-JAX reference ----------------------------

def nice_forward_ref(x, masks, w_in, b_in, w_hid, b_hid, w_out, b_out, log_scale):
    z = x.astype(jnp.float32)
    for i in range(NUM_COUPLING_LAYERS):
        mask = masks[i]
        h = z * mask @ w_in[i] + b_in[i]
        h = jnp.where(h > 0, h, LEAKY_SLOPE * h)
        for j in range(NUM_HIDDEN_LINEARS):
            h = h @ w_hid[i, j] + b_hid[i, j]
            h = jnp.where(h > 0, h, LEAKY_SLOPE * h)
        z = z + (1.0 - mask) * (h @ w_out[i] + b_out[i])
    z = jnp.exp(log_scale) * z
    log_det = jnp.sum(log_scale)
    ll = jnp.sum(-(jax.nn.softplus(z) + jax.nn.softplus(-z)), axis=1) + log_det
    return z, ll


if __name__ == "__main__":
    DATA_DIM, HIDDEN_DIM = 16, 32

    key = jax.random.PRNGKey(0)
    k_x1, k_x2, k_p = jax.random.split(key, 3)
    masks = make_masks(DATA_DIM)
    params = init_params(k_p, DATA_DIM, HIDDEN_DIM)

    # B=8: single grid step; B=600: multi-step batch grid (TB=256) with row padding.
    for B, kx in ((8, k_x1), (600, k_x2)):
        x = jax.random.normal(kx, (B, DATA_DIM), jnp.float32)

        z, ll = nice_forward(x, masks, *params)
        jax.block_until_ready((z, ll))

        z_ref, ll_ref = nice_forward_ref(x, masks, *params)
        assert z.shape == (B, DATA_DIM) and ll.shape == (B,)
        # bf16 MXU operands with f32 accumulation -> slightly loose tolerance vs f32 ref.
        assert jnp.allclose(z, z_ref, rtol=3e-2, atol=3e-2), "z mismatch"
        assert jnp.allclose(ll, ll_ref, rtol=3e-2, atol=3e-2), "log-likelihood mismatch"

    print("KERNEL_OK")
</pallas_src>

<mosaic_0001>
module attributes {stable_mosaic.version = 11 : i64} {
  func.func @_nice_kernel(%arg0: i32, %arg1: memref<8x16xf32, #tpu.memory_space<vmem>>, %arg2: memref<1x16xf32, #tpu.memory_space<vmem>>, %arg3: memref<3x16x32xbf16, #tpu.memory_space<vmem>>, %arg4: memref<3x32xf32, #tpu.memory_space<vmem>>, %arg5: memref<3x4x32x32xbf16, #tpu.memory_space<vmem>>, %arg6: memref<3x4x32xf32, #tpu.memory_space<vmem>>, %arg7: memref<3x32x16xbf16, #tpu.memory_space<vmem>>, %arg8: memref<3x16xf32, #tpu.memory_space<vmem>>, %arg9: memref<8x16xf32, #tpu.memory_space<vmem>>, %arg10: memref<8x1xf32, #tpu.memory_space<vmem>>) attributes {dimension_semantics = [#tpu.dimension_semantics<parallel>], iteration_bounds = array<i64: 1>, scalar_prefetch = 0 : i64, scratch_operands = 0 : i64, tpu.core_type = #tpu.core_type<tc>, window_params = [{transform_indices = @transform_0, window_bounds = array<i64: 8, 16>}, {pipeline_mode = #tpu.pipeline_mode<synchronous>, transform_indices = @transform_1, window_bounds = array<i64: 1, 16>}, {pipeline_mode = #tpu.pipeline_mode<synchronous>, transform_indices = @transform_2, window_bounds = array<i64: 3, 16, 32>}, {pipeline_mode = #tpu.pipeline_mode<synchronous>, transform_indices = @transform_3, window_bounds = array<i64: 3, 32>}, {pipeline_mode = #tpu.pipeline_mode<synchronous>, transform_indices = @transform_4, window_bounds = array<i64: 3, 4, 32, 32>}, {pipeline_mode = #tpu.pipeline_mode<synchronous>, transform_indices = @transform_5, window_bounds = array<i64: 3, 4, 32>}, {pipeline_mode = #tpu.pipeline_mode<synchronous>, transform_indices = @transform_6, window_bounds = array<i64: 3, 32, 16>}, {pipeline_mode = #tpu.pipeline_mode<synchronous>, transform_indices = @transform_7, window_bounds = array<i64: 3, 16>}, {transform_indices = @transform_8, window_bounds = array<i64: 8, 16>}, {transform_indices = @transform_9, window_bounds = array<i64: 8, 1>}]} {
    %c0 = arith.constant 0 : index
    %c0_0 = arith.constant 0 : index
    %0 = vector.load %arg1[%c0, %c0_0] : memref<8x16xf32, #tpu.memory_space<vmem>>, vector<8x16xf32>
    %1 = arith.truncf %0 : vector<8x16xf32> to vector<8x16xbf16>
    %c0_1 = arith.constant 0 : index
    %c0_2 = arith.constant 0 : index
    %c0_3 = arith.constant 0 : index
    %2 = vector.load %arg3[%c0_1, %c0_2, %c0_3] : memref<3x16x32xbf16, #tpu.memory_space<vmem>>, vector<1x16x32xbf16>
    %3 = vector.shape_cast %2 : vector<1x16x32xbf16> to vector<16x32xbf16>
    %cst = arith.constant dense<0.000000e+00> : vector<8x32xf32>
    %4 = tpu.matmul %1, %3, %cst {dimension_numbers = #tpu.dot_dimension_numbers<[1], [0], [0], [1], [0, 0, 1, 1], [], []>} : vector<8x16xbf16>, vector<16x32xbf16>, vector<8x32xf32> -> vector<8x32xf32>
    %c0_4 = arith.constant 0 : index
    %c0_5 = arith.constant 0 : index
    %5 = vector.load %arg4[%c0_4, %c0_5] : memref<3x32xf32, #tpu.memory_space<vmem>>, vector<1x32xf32>
    %6 = vector.shape_cast %5 : vector<1x32xf32> to vector<32xf32>
    %7 = vector.shape_cast %6 : vector<32xf32> to vector<1x32xf32>
    %8 = vector.broadcast %7 : vector<1x32xf32> to vector<8x32xf32>
    %9 = arith.addf %4, %8 : vector<8x32xf32>
    %cst_6 = arith.constant 0.000000e+00 : f32
    %10 = vector.broadcast %cst_6 : f32 to vector<8x32xf32>
    %11 = arith.cmpf ogt, %9, %10 : vector<8x32xf32>
    %cst_7 = arith.constant 2.000000e-01 : f32
    %12 = vector.broadcast %cst_7 : f32 to vector<8x32xf32>
    %13 = arith.mulf %12, %9 : vector<8x32xf32>
    %14 = arith.select %11, %9, %13 : vector<8x32xi1>, vector<8x32xf32>
    %15 = arith.truncf %14 : vector<8x32xf32> to vector<8x32xbf16>
    %c0_8 = arith.constant 0 : index
    %c0_9 = arith.constant 0 : index
    %c0_10 = arith.constant 0 : index
    %c0_11 = arith.constant 0 : index
    %16 = vector.load %arg5[%c0_8, %c0_9, %c0_10, %c0_11] : memref<3x4x32x32xbf16, #tpu.memory_space<vmem>>, vector<1x1x32x32xbf16>
    %17 = vector.shape_cast %16 : vector<1x1x32x32xbf16> to vector<32x32xbf16>
    %cst_12 = arith.constant dense<0.000000e+00> : vector<8x32xf32>
    %18 = tpu.matmul %15, %17, %cst_12 {dimension_numbers = #tpu.dot_dimension_numbers<[1], [0], [0], [1], [0, 0, 1, 1], [], []>} : vector<8x32xbf16>, vector<32x32xbf16>, vector<8x32xf32> -> vector<8x32xf32>
    %c0_13 = arith.constant 0 : index
    %c0_14 = arith.constant 0 : index
    %c0_15 = arith.constant 0 : index
    %19 = vector.load %arg6[%c0_13, %c0_14, %c0_15] : memref<3x4x32xf32, #tpu.memory_space<vmem>>, vector<1x1x32xf32>
    %20 = vector.shape_cast %19 : vector<1x1x32xf32> to vector<32xf32>
    %21 = vector.shape_cast %20 : vector<32xf32> to vector<1x32xf32>
    %22 = vector.broadcast %21 : vector<1x32xf32> to vector<8x32xf32>
    %23 = arith.addf %18, %22 : vector<8x32xf32>
    %cst_16 = arith.constant 0.000000e+00 : f32
    %24 = vector.broadcast %cst_16 : f32 to vector<8x32xf32>
    %25 = arith.cmpf ogt, %23, %24 : vector<8x32xf32>
    %cst_17 = arith.constant 2.000000e-01 : f32
    %26 = vector.broadcast %cst_17 : f32 to vector<8x32xf32>
    %27 = arith.mulf %26, %23 : vector<8x32xf32>
    %28 = arith.select %25, %23, %27 : vector<8x32xi1>, vector<8x32xf32>
    %29 = arith.truncf %28 : vector<8x32xf32> to vector<8x32xbf16>
    %c0_18 = arith.constant 0 : index
    %c1 = arith.constant 1 : index
    %c0_19 = arith.constant 0 : index
    %c0_20 = arith.constant 0 : index
    %30 = vector.load %arg5[%c0_18, %c1, %c0_19, %c0_20] : memref<3x4x32x32xbf16, #tpu.memory_space<vmem>>, vector<1x1x32x32xbf16>
    %31 = vector.shape_cast %30 : vector<1x1x32x32xbf16> to vector<32x32xbf16>
    %cst_21 = arith.constant dense<0.000000e+00> : vector<8x32xf32>
    %32 = tpu.matmul %29, %31, %cst_21 {dimension_numbers = #tpu.dot_dimension_numbers<[1], [0], [0], [1], [0, 0, 1, 1], [], []>} : vector<8x32xbf16>, vector<32x32xbf16>, vector<8x32xf32> -> vector<8x32xf32>
    %c0_22 = arith.constant 0 : index
    %c1_23 = arith.constant 1 : index
    %c0_24 = arith.constant 0 : index
    %33 = vector.load %arg6[%c0_22, %c1_23, %c0_24] : memref<3x4x32xf32, #tpu.memory_space<vmem>>, vector<1x1x32xf32>
    %34 = vector.shape_cast %33 : vector<1x1x32xf32> to vector<32xf32>
    %35 = vector.shape_cast %34 : vector<32xf32> to vector<1x32xf32>
    %36 = vector.broadcast %35 : vector<1x32xf32> to vector<8x32xf32>
    %37 = arith.addf %32, %36 : vector<8x32xf32>
    %cst_25 = arith.constant 0.000000e+00 : f32
    %38 = vector.broadcast %cst_25 : f32 to vector<8x32xf32>
    %39 = arith.cmpf ogt, %37, %38 : vector<8x32xf32>
    %cst_26 = arith.constant 2.000000e-01 : f32
    %40 = vector.broadcast %cst_26 : f32 to vector<8x32xf32>
    %41 = arith.mulf %40, %37 : vector<8x32xf32>
    %42 = arith.select %39, %37, %41 : vector<8x32xi1>, vector<8x32xf32>
    %43 = arith.truncf %42 : vector<8x32xf32> to vector<8x32xbf16>
    %c0_27 = arith.constant 0 : index
    %c2 = arith.constant 2 : index
    %c0_28 = arith.constant 0 : index
    %c0_29 = arith.constant 0 : index
    %44 = vector.load %arg5[%c0_27, %c2, %c0_28, %c0_29] : memref<3x4x32x32xbf16, #tpu.memory_space<vmem>>, vector<1x1x32x32xbf16>
    %45 = vector.shape_cast %44 : vector<1x1x32x32xbf16> to vector<32x32xbf16>
    %cst_30 = arith.constant dense<0.000000e+00> : vector<8x32xf32>
    %46 = tpu.matmul %43, %45, %cst_30 {dimension_numbers = #tpu.dot_dimension_numbers<[1], [0], [0], [1], [0, 0, 1, 1], [], []>} : vector<8x32xbf16>, vector<32x32xbf16>, vector<8x32xf32> -> vector<8x32xf32>
    %c0_31 = arith.constant 0 : index
    %c2_32 = arith.constant 2 : index
    %c0_33 = arith.constant 0 : index
    %47 = vector.load %arg6[%c0_31, %c2_32, %c0_33] : memref<3x4x32xf32, #tpu.memory_space<vmem>>, vector<1x1x32xf32>
    %48 = vector.shape_cast %47 : vector<1x1x32xf32> to vector<32xf32>
    %49 = vector.shape_cast %48 : vector<32xf32> to vector<1x32xf32>
    %50 = vector.broadcast %49 : vector<1x32xf32> to vector<8x32xf32>
    %51 = arith.addf %46, %50 : vector<8x32xf32>
    %cst_34 = arith.constant 0.000000e+00 : f32
    %52 = vector.broadcast %cst_34 : f32 to vector<8x32xf32>
    %53 = arith.cmpf ogt, %51, %52 : vector<8x32xf32>
    %cst_35 = arith.constant 2.000000e-01 : f32
    %54 = vector.broadcast %cst_35 : f32 to vector<8x32xf32>
    %55 = arith.mulf %54, %51 : vector<8x32xf32>
    %56 = arith.select %53, %51, %55 : vector<8x32xi1>, vector<8x32xf32>
    %57 = arith.truncf %56 : vector<8x32xf32> to vector<8x32xbf16>
    %c0_36 = arith.constant 0 : index
    %c3 = arith.constant 3 : index
    %c0_37 = arith.constant 0 : index
    %c0_38 = arith.constant 0 : index
    %58 = vector.load %arg5[%c0_36, %c3, %c0_37, %c0_38] : memref<3x4x32x32xbf16, #tpu.memory_space<vmem>>, vector<1x1x32x32xbf16>
    %59 = vector.shape_cast %58 : vector<1x1x32x32xbf16> to vector<32x32xbf16>
    %cst_39 = arith.constant dense<0.000000e+00> : vector<8x32xf32>
    %60 = tpu.matmul %57, %59, %cst_39 {dimension_numbers = #tpu.dot_dimension_numbers<[1], [0], [0], [1], [0, 0, 1, 1], [], []>} : vector<8x32xbf16>, vector<32x32xbf16>, vector<8x32xf32> -> vector<8x32xf32>
    %c0_40 = arith.constant 0 : index
    %c3_41 = arith.constant 3 : index
    %c0_42 = arith.constant 0 : index
    %61 = vector.load %arg6[%c0_40, %c3_41, %c0_42] : memref<3x4x32xf32, #tpu.memory_space<vmem>>, vector<1x1x32xf32>
    %62 = vector.shape_cast %61 : vector<1x1x32xf32> to vector<32xf32>
    %63 = vector.shape_cast %62 : vector<32xf32> to vector<1x32xf32>
    %64 = vector.broadcast %63 : vector<1x32xf32> to vector<8x32xf32>
    %65 = arith.addf %60, %64 : vector<8x32xf32>
    %cst_43 = arith.constant 0.000000e+00 : f32
    %66 = vector.broadcast %cst_43 : f32 to vector<8x32xf32>
    %67 = arith.cmpf ogt, %65, %66 : vector<8x32xf32>
    %cst_44 = arith.constant 2.000000e-01 : f32
    %68 = vector.broadcast %cst_44 : f32 to vector<8x32xf32>
    %69 = arith.mulf %68, %65 : vector<8x32xf32>
    %70 = arith.select %67, %65, %69 : vector<8x32xi1>, vector<8x32xf32>
    %71 = arith.truncf %70 : vector<8x32xf32> to vector<8x32xbf16>
    %c0_45 = arith.constant 0 : index
    %c0_46 = arith.constant 0 : index
    %c0_47 = arith.constant 0 : index
    %72 = vector.load %arg7[%c0_45, %c0_46, %c0_47] : memref<3x32x16xbf16, #tpu.memory_space<vmem>>, vector<1x32x16xbf16>
    %73 = vector.shape_cast %72 : vector<1x32x16xbf16> to vector<32x16xbf16>
    %cst_48 = arith.constant dense<0.000000e+00> : vector<8x16xf32>
    %74 = tpu.matmul %71, %73, %cst_48 {dimension_numbers = #tpu.dot_dimension_numbers<[1], [0], [0], [1], [0, 0, 1, 1], [], []>} : vector<8x32xbf16>, vector<32x16xbf16>, vector<8x16xf32> -> vector<8x16xf32>
    %75 = arith.addf %0, %74 : vector<8x16xf32>
    %c0_49 = arith.constant 0 : index
    %c0_50 = arith.constant 0 : index
    %76 = vector.load %arg8[%c0_49, %c0_50] : memref<3x16xf32, #tpu.memory_space<vmem>>, vector<1x16xf32>
    %77 = vector.shape_cast %76 : vector<1x16xf32> to vector<16xf32>
    %78 = vector.shape_cast %77 : vector<16xf32> to vector<1x16xf32>
    %79 = vector.broadcast %78 : vector<1x16xf32> to vector<8x16xf32>
    %80 = arith.addf %75, %79 : vector<8x16xf32>
    %81 = arith.truncf %80 : vector<8x16xf32> to vector<8x16xbf16>
    %c1_51 = arith.constant 1 : index
    %c0_52 = arith.constant 0 : index
    %c0_53 = arith.constant 0 : index
    %82 = vector.load %arg3[%c1_51, %c0_52, %c0_53] : memref<3x16x32xbf16, #tpu.memory_space<vmem>>, vector<1x16x32xbf16>
    %83 = vector.shape_cast %82 : vector<1x16x32xbf16> to vector<16x32xbf16>
    %cst_54 = arith.constant dense<0.000000e+00> : vector<8x32xf32>
    %84 = tpu.matmul %81, %83, %cst_54 {dimension_numbers = #tpu.dot_dimension_numbers<[1], [0], [0], [1], [0, 0, 1, 1], [], []>} : vector<8x16xbf16>, vector<16x32xbf16>, vector<8x32xf32> -> vector<8x32xf32>
    %c1_55 = arith.constant 1 : index
    %c0_56 = arith.constant 0 : index
    %85 = vector.load %arg4[%c1_55, %c0_56] : memref<3x32xf32, #tpu.memory_space<vmem>>, vector<1x32xf32>
    %86 = vector.shape_cast %85 : vector<1x32xf32> to vector<32xf32>
    %87 = vector.shape_cast %86 : vector<32xf32> to vector<1x32xf32>
    %88 = vector.broadcast %87 : vector<1x32xf32> to vector<8x32xf32>
    %89 = arith.addf %84, %88 : vector<8x32xf32>
    %cst_57 = arith.constant 0.000000e+00 : f32
    %90 = vector.broadcast %cst_57 : f32 to vector<8x32xf32>
    %91 = arith.cmpf ogt, %89, %90 : vector<8x32xf32>
    %cst_58 = arith.constant 2.000000e-01 : f32
    %92 = vector.broadcast %cst_58 : f32 to vector<8x32xf32>
    %93 = arith.mulf %92, %89 : vector<8x32xf32>
    %94 = arith.select %91, %89, %93 : vector<8x32xi1>, vector<8x32xf32>
    %95 = arith.truncf %94 : vector<8x32xf32> to vector<8x32xbf16>
    %c1_59 = arith.constant 1 : index
    %c0_60 = arith.constant 0 : index
    %c0_61 = arith.constant 0 : index
    %c0_62 = arith.constant 0 : index
    %96 = vector.load %arg5[%c1_59, %c0_60, %c0_61, %c0_62] : memref<3x4x32x32xbf16, #tpu.memory_space<vmem>>, vector<1x1x32x32xbf16>
    %97 = vector.shape_cast %96 : vector<1x1x32x32xbf16> to vector<32x32xbf16>
    %cst_63 = arith.constant dense<0.000000e+00> : vector<8x32xf32>
    %98 = tpu.matmul %95, %97, %cst_63 {dimension_numbers = #tpu.dot_dimension_numbers<[1], [0], [0], [1], [0, 0, 1, 1], [], []>} : vector<8x32xbf16>, vector<32x32xbf16>, vector<8x32xf32> -> vector<8x32xf32>
    %c1_64 = arith.constant 1 : index
    %c0_65 = arith.constant 0 : index
    %c0_66 = arith.constant 0 : index
    %99 = vector.load %arg6[%c1_64, %c0_65, %c0_66] : memref<3x4x32xf32, #tpu.memory_space<vmem>>, vector<1x1x32xf32>
    %100 = vector.shape_cast %99 : vector<1x1x32xf32> to vector<32xf32>
    %101 = vector.shape_cast %100 : vector<32xf32> to vector<1x32xf32>
    %102 = vector.broadcast %101 : vector<1x32xf32> to vector<8x32xf32>
    %103 = arith.addf %98, %102 : vector<8x32xf32>
    %cst_67 = arith.constant 0.000000e+00 : f32
    %104 = vector.broadcast %cst_67 : f32 to vector<8x32xf32>
    %105 = arith.cmpf ogt, %103, %104 : vector<8x32xf32>
    %cst_68 = arith.constant 2.000000e-01 : f32
    %106 = vector.broadcast %cst_68 : f32 to vector<8x32xf32>
    %107 = arith.mulf %106, %103 : vector<8x32xf32>
    %108 = arith.select %105, %103, %107 : vector<8x32xi1>, vector<8x32xf32>
    %109 = arith.truncf %108 : vector<8x32xf32> to vector<8x32xbf16>
    %c1_69 = arith.constant 1 : index
    %c1_70 = arith.constant 1 : index
    %c0_71 = arith.constant 0 : index
    %c0_72 = arith.constant 0 : index
    %110 = vector.load %arg5[%c1_69, %c1_70, %c0_71, %c0_72] : memref<3x4x32x32xbf16, #tpu.memory_space<vmem>>, vector<1x1x32x32xbf16>
    %111 = vector.shape_cast %110 : vector<1x1x32x32xbf16> to vector<32x32xbf16>
    %cst_73 = arith.constant dense<0.000000e+00> : vector<8x32xf32>
    %112 = tpu.matmul %109, %111, %cst_73 {dimension_numbers = #tpu.dot_dimension_numbers<[1], [0], [0], [1], [0, 0, 1, 1], [], []>} : vector<8x32xbf16>, vector<32x32xbf16>, vector<8x32xf32> -> vector<8x32xf32>
    %c1_74 = arith.constant 1 : index
    %c1_75 = arith.constant 1 : index
    %c0_76 = arith.constant 0 : index
    %113 = vector.load %arg6[%c1_74, %c1_75, %c0_76] : memref<3x4x32xf32, #tpu.memory_space<vmem>>, vector<1x1x32xf32>
    %114 = vector.shape_cast %113 : vector<1x1x32xf32> to vector<32xf32>
    %115 = vector.shape_cast %114 : vector<32xf32> to vector<1x32xf32>
    %116 = vector.broadcast %115 : vector<1x32xf32> to vector<8x32xf32>
    %117 = arith.addf %112, %116 : vector<8x32xf32>
    %cst_77 = arith.constant 0.000000e+00 : f32
    %118 = vector.broadcast %cst_77 : f32 to vector<8x32xf32>
    %119 = arith.cmpf ogt, %117, %118 : vector<8x32xf32>
    %cst_78 = arith.constant 2.000000e-01 : f32
    %120 = vector.broadcast %cst_78 : f32 to vector<8x32xf32>
    %121 = arith.mulf %120, %117 : vector<8x32xf32>
    %122 = arith.select %119, %117, %121 : vector<8x32xi1>, vector<8x32xf32>
    %123 = arith.truncf %122 : vector<8x32xf32> to vector<8x32xbf16>
    %c1_79 = arith.constant 1 : index
    %c2_80 = arith.constant 2 : index
    %c0_81 = arith.constant 0 : index
    %c0_82 = arith.constant 0 : index
    %124 = vector.load %arg5[%c1_79, %c2_80, %c0_81, %c0_82] : memref<3x4x32x32xbf16, #tpu.memory_space<vmem>>, vector<1x1x32x32xbf16>
    %125 = vector.shape_cast %124 : vector<1x1x32x32xbf16> to vector<32x32xbf16>
    %cst_83 = arith.constant dense<0.000000e+00> : vector<8x32xf32>
    %126 = tpu.matmul %123, %125, %cst_83 {dimension_numbers = #tpu.dot_dimension_numbers<[1], [0], [0], [1], [0, 0, 1, 1], [], []>} : vector<8x32xbf16>, vector<32x32xbf16>, vector<8x32xf32> -> vector<8x32xf32>
    %c1_84 = arith.constant 1 : index
    %c2_85 = arith.constant 2 : index
    %c0_86 = arith.constant 0 : index
    %127 = vector.load %arg6[%c1_84, %c2_85, %c0_86] : memref<3x4x32xf32, #tpu.memory_space<vmem>>, vector<1x1x32xf32>
    %128 = vector.shape_cast %127 : vector<1x1x32xf32> to vector<32xf32>
    %129 = vector.shape_cast %128 : vector<32xf32> to vector<1x32xf32>
    %130 = vector.broadcast %129 : vector<1x32xf32> to vector<8x32xf32>
    %131 = arith.addf %126, %130 : vector<8x32xf32>
    %cst_87 = arith.constant 0.000000e+00 : f32
    %132 = vector.broadcast %cst_87 : f32 to vector<8x32xf32>
    %133 = arith.cmpf ogt, %131, %132 : vector<8x32xf32>
    %cst_88 = arith.constant 2.000000e-01 : f32
    %134 = vector.broadcast %cst_88 : f32 to vector<8x32xf32>
    %135 = arith.mulf %134, %131 : vector<8x32xf32>
    %136 = arith.select %133, %131, %135 : vector<8x32xi1>, vector<8x32xf32>
    %137 = arith.truncf %136 : vector<8x32xf32> to vector<8x32xbf16>
    %c1_89 = arith.constant 1 : index
    %c3_90 = arith.constant 3 : index
    %c0_91 = arith.constant 0 : index
    %c0_92 = arith.constant 0 : index
    %138 = vector.load %arg5[%c1_89, %c3_90, %c0_91, %c0_92] : memref<3x4x32x32xbf16, #tpu.memory_space<vmem>>, vector<1x1x32x32xbf16>
    %139 = vector.shape_cast %138 : vector<1x1x32x32xbf16> to vector<32x32xbf16>
    %cst_93 = arith.constant dense<0.000000e+00> : vector<8x32xf32>
    %140 = tpu.matmul %137, %139, %cst_93 {dimension_numbers = #tpu.dot_dimension_numbers<[1], [0], [0], [1], [0, 0, 1, 1], [], []>} : vector<8x32xbf16>, vector<32x32xbf16>, vector<8x32xf32> -> vector<8x32xf32>
    %c1_94 = arith.constant 1 : index
    %c3_95 = arith.constant 3 : index
    %c0_96 = arith.constant 0 : index
    %141 = vector.load %arg6[%c1_94, %c3_95, %c0_96] : memref<3x4x32xf32, #tpu.memory_space<vmem>>, vector<1x1x32xf32>
    %142 = vector.shape_cast %141 : vector<1x1x32xf32> to vector<32xf32>
    %143 = vector.shape_cast %142 : vector<32xf32> to vector<1x32xf32>
    %144 = vector.broadcast %143 : vector<1x32xf32> to vector<8x32xf32>
    %145 = arith.addf %140, %144 : vector<8x32xf32>
    %cst_97 = arith.constant 0.000000e+00 : f32
    %146 = vector.broadcast %cst_97 : f32 to vector<8x32xf32>
    %147 = arith.cmpf ogt, %145, %146 : vector<8x32xf32>
    %cst_98 = arith.constant 2.000000e-01 : f32
    %148 = vector.broadcast %cst_98 : f32 to vector<8x32xf32>
    %149 = arith.mulf %148, %145 : vector<8x32xf32>
    %150 = arith.select %147, %145, %149 : vector<8x32xi1>, vector<8x32xf32>
    %151 = arith.truncf %150 : vector<8x32xf32> to vector<8x32xbf16>
    %c1_99 = arith.constant 1 : index
    %c0_100 = arith.constant 0 : index
    %c0_101 = arith.constant 0 : index
    %152 = vector.load %arg7[%c1_99, %c0_100, %c0_101] : memref<3x32x16xbf16, #tpu.memory_space<vmem>>, vector<1x32x16xbf16>
    %153 = vector.shape_cast %152 : vector<1x32x16xbf16> to vector<32x16xbf16>
    %cst_102 = arith.constant dense<0.000000e+00> : vector<8x16xf32>
    %154 = tpu.matmul %151, %153, %cst_102 {dimension_numbers = #tpu.dot_dimension_numbers<[1], [0], [0], [1], [0, 0, 1, 1], [], []>} : vector<8x32xbf16>, vector<32x16xbf16>, vector<8x16xf32> -> vector<8x16xf32>
    %155 = arith.addf %80, %154 : vector<8x16xf32>
    %c1_103 = arith.constant 1 : index
    %c0_104 = arith.constant 0 : index
    %156 = vector.load %arg8[%c1_103, %c0_104] : memref<3x16xf32, #tpu.memory_space<vmem>>, vector<1x16xf32>
    %157 = vector.shape_cast %156 : vector<1x16xf32> to vector<16xf32>
    %158 = vector.shape_cast %157 : vector<16xf32> to vector<1x16xf32>
    %159 = vector.broadcast %158 : vector<1x16xf32> to vector<8x16xf32>
    %160 = arith.addf %155, %159 : vector<8x16xf32>
    %161 = arith.truncf %160 : vector<8x16xf32> to vector<8x16xbf16>
    %c2_105 = arith.constant 2 : index
    %c0_106 = arith.constant 0 : index
    %c0_107 = arith.constant 0 : index
    %162 = vector.load %arg3[%c2_105, %c0_106, %c0_107] : memref<3x16x32xbf16, #tpu.memory_space<vmem>>, vector<1x16x32xbf16>
    %163 = vector.shape_cast %162 : vector<1x16x32xbf16> to vector<16x32xbf16>
    %cst_108 = arith.constant dense<0.000000e+00> : vector<8x32xf32>
    %164 = tpu.matmul %161, %163, %cst_108 {dimension_numbers = #tpu.dot_dimension_numbers<[1], [0], [0], [1], [0, 0, 1, 1], [], []>} : vector<8x16xbf16>, vector<16x32xbf16>, vector<8x32xf32> -> vector<8x32xf32>
    %c2_109 = arith.constant 2 : index
    %c0_110 = arith.constant 0 : index
    %165 = vector.load %arg4[%c2_109, %c0_110] : memref<3x32xf32, #tpu.memory_space<vmem>>, vector<1x32xf32>
    %166 = vector.shape_cast %165 : vector<1x32xf32> to vector<32xf32>
    %167 = vector.shape_cast %166 : vector<32xf32> to vector<1x32xf32>
    %168 = vector.broadcast %167 : vector<1x32xf32> to vector<8x32xf32>
    %169 = arith.addf %164, %168 : vector<8x32xf32>
    %cst_111 = arith.constant 0.000000e+00 : f32
    %170 = vector.broadcast %cst_111 : f32 to vector<8x32xf32>
    %171 = arith.cmpf ogt, %169, %170 : vector<8x32xf32>
    %cst_112 = arith.constant 2.000000e-01 : f32
    %172 = vector.broadcast %cst_112 : f32 to vector<8x32xf32>
    %173 = arith.mulf %172, %169 : vector<8x32xf32>
    %174 = arith.select %171, %169, %173 : vector<8x32xi1>, vector<8x32xf32>
    %175 = arith.truncf %174 : vector<8x32xf32> to vector<8x32xbf16>
    %c2_113 = arith.constant 2 : index
    %c0_114 = arith.constant 0 : index
    %c0_115 = arith.constant 0 : index
    %c0_116 = arith.constant 0 : index
    %176 = vector.load %arg5[%c2_113, %c0_114, %c0_115, %c0_116] : memref<3x4x32x32xbf16, #tpu.memory_space<vmem>>, vector<1x1x32x32xbf16>
    %177 = vector.shape_cast %176 : vector<1x1x32x32xbf16> to vector<32x32xbf16>
    %cst_117 = arith.constant dense<0.000000e+00> : vector<8x32xf32>
    %178 = tpu.matmul %175, %177, %cst_117 {dimension_numbers = #tpu.dot_dimension_numbers<[1], [0], [0], [1], [0, 0, 1, 1], [], []>} : vector<8x32xbf16>, vector<32x32xbf16>, vector<8x32xf32> -> vector<8x32xf32>
    %c2_118 = arith.constant 2 : index
    %c0_119 = arith.constant 0 : index
    %c0_120 = arith.constant 0 : index
    %179 = vector.load %arg6[%c2_118, %c0_119, %c0_120] : memref<3x4x32xf32, #tpu.memory_space<vmem>>, vector<1x1x32xf32>
    %180 = vector.shape_cast %179 : vector<1x1x32xf32> to vector<32xf32>
    %181 = vector.shape_cast %180 : vector<32xf32> to vector<1x32xf32>
    %182 = vector.broadcast %181 : vector<1x32xf32> to vector<8x32xf32>
    %183 = arith.addf %178, %182 : vector<8x32xf32>
    %cst_121 = arith.constant 0.000000e+00 : f32
    %184 = vector.broadcast %cst_121 : f32 to vector<8x32xf32>
    %185 = arith.cmpf ogt, %183, %184 : vector<8x32xf32>
    %cst_122 = arith.constant 2.000000e-01 : f32
    %186 = vector.broadcast %cst_122 : f32 to vector<8x32xf32>
    %187 = arith.mulf %186, %183 : vector<8x32xf32>
    %188 = arith.select %185, %183, %187 : vector<8x32xi1>, vector<8x32xf32>
    %189 = arith.truncf %188 : vector<8x32xf32> to vector<8x32xbf16>
    %c2_123 = arith.constant 2 : index
    %c1_124 = arith.constant 1 : index
    %c0_125 = arith.constant 0 : index
    %c0_126 = arith.constant 0 : index
    %190 = vector.load %arg5[%c2_123, %c1_124, %c0_125, %c0_126] : memref<3x4x32x32xbf16, #tpu.memory_space<vmem>>, vector<1x1x32x32xbf16>
    %191 = vector.shape_cast %190 : vector<1x1x32x32xbf16> to vector<32x32xbf16>
    %cst_127 = arith.constant dense<0.000000e+00> : vector<8x32xf32>
    %192 = tpu.matmul %189, %191, %cst_127 {dimension_numbers = #tpu.dot_dimension_numbers<[1], [0], [0], [1], [0, 0, 1, 1], [], []>} : vector<8x32xbf16>, vector<32x32xbf16>, vector<8x32xf32> -> vector<8x32xf32>
    %c2_128 = arith.constant 2 : index
    %c1_129 = arith.constant 1 : index
    %c0_130 = arith.constant 0 : index
    %193 = vector.load %arg6[%c2_128, %c1_129, %c0_130] : memref<3x4x32xf32, #tpu.memory_space<vmem>>, vector<1x1x32xf32>
    %194 = vector.shape_cast %193 : vector<1x1x32xf32> to vector<32xf32>
    %195 = vector.shape_cast %194 : vector<32xf32> to vector<1x32xf32>
    %196 = vector.broadcast %195 : vector<1x32xf32> to vector<8x32xf32>
    %197 = arith.addf %192, %196 : vector<8x32xf32>
    %cst_131 = arith.constant 0.000000e+00 : f32
    %198 = vector.broadcast %cst_131 : f32 to vector<8x32xf32>
    %199 = arith.cmpf ogt, %197, %198 : vector<8x32xf32>
    %cst_132 = arith.constant 2.000000e-01 : f32
    %200 = vector.broadcast %cst_132 : f32 to vector<8x32xf32>
    %201 = arith.mulf %200, %197 : vector<8x32xf32>
    %202 = arith.select %199, %197, %201 : vector<8x32xi1>, vector<8x32xf32>
    %203 = arith.truncf %202 : vector<8x32xf32> to vector<8x32xbf16>
    %c2_133 = arith.constant 2 : index
    %c2_134 = arith.constant 2 : index
    %c0_135 = arith.constant 0 : index
    %c0_136 = arith.constant 0 : index
    %204 = vector.load %arg5[%c2_133, %c2_134, %c0_135, %c0_136] : memref<3x4x32x32xbf16, #tpu.memory_space<vmem>>, vector<1x1x32x32xbf16>
    %205 = vector.shape_cast %204 : vector<1x1x32x32xbf16> to vector<32x32xbf16>
    %cst_137 = arith.constant dense<0.000000e+00> : vector<8x32xf32>
    %206 = tpu.matmul %203, %205, %cst_137 {dimension_numbers = #tpu.dot_dimension_numbers<[1], [0], [0], [1], [0, 0, 1, 1], [], []>} : vector<8x32xbf16>, vector<32x32xbf16>, vector<8x32xf32> -> vector<8x32xf32>
    %c2_138 = arith.constant 2 : index
    %c2_139 = arith.constant 2 : index
    %c0_140 = arith.constant 0 : index
    %207 = vector.load %arg6[%c2_138, %c2_139, %c0_140] : memref<3x4x32xf32, #tpu.memory_space<vmem>>, vector<1x1x32xf32>
    %208 = vector.shape_cast %207 : vector<1x1x32xf32> to vector<32xf32>
    %209 = vector.shape_cast %208 : vector<32xf32> to vector<1x32xf32>
    %210 = vector.broadcast %209 : vector<1x32xf32> to vector<8x32xf32>
    %211 = arith.addf %206, %210 : vector<8x32xf32>
    %cst_141 = arith.constant 0.000000e+00 : f32
    %212 = vector.broadcast %cst_141 : f32 to vector<8x32xf32>
    %213 = arith.cmpf ogt, %211, %212 : vector<8x32xf32>
    %cst_142 = arith.constant 2.000000e-01 : f32
    %214 = vector.broadcast %cst_142 : f32 to vector<8x32xf32>
    %215 = arith.mulf %214, %211 : vector<8x32xf32>
    %216 = arith.select %213, %211, %215 : vector<8x32xi1>, vector<8x32xf32>
    %217 = arith.truncf %216 : vector<8x32xf32> to vector<8x32xbf16>
    %c2_143 = arith.constant 2 : index
    %c3_144 = arith.constant 3 : index
    %c0_145 = arith.constant 0 : index
    %c0_146 = arith.constant 0 : index
    %218 = vector.load %arg5[%c2_143, %c3_144, %c0_145, %c0_146] : memref<3x4x32x32xbf16, #tpu.memory_space<vmem>>, vector<1x1x32x32xbf16>
    %219 = vector.shape_cast %218 : vector<1x1x32x32xbf16> to vector<32x32xbf16>
    %cst_147 = arith.constant dense<0.000000e+00> : vector<8x32xf32>
    %220 = tpu.matmul %217, %219, %cst_147 {dimension_numbers = #tpu.dot_dimension_numbers<[1], [0], [0], [1], [0, 0, 1, 1], [], []>} : vector<8x32xbf16>, vector<32x32xbf16>, vector<8x32xf32> -> vector<8x32xf32>
    %c2_148 = arith.constant 2 : index
    %c3_149 = arith.constant 3 : index
    %c0_150 = arith.constant 0 : index
    %221 = vector.load %arg6[%c2_148, %c3_149, %c0_150] : memref<3x4x32xf32, #tpu.memory_space<vmem>>, vector<1x1x32xf32>
    %222 = vector.shape_cast %221 : vector<1x1x32xf32> to vector<32xf32>
    %223 = vector.shape_cast %222 : vector<32xf32> to vector<1x32xf32>
    %224 = vector.broadcast %223 : vector<1x32xf32> to vector<8x32xf32>
    %225 = arith.addf %220, %224 : vector<8x32xf32>
    %cst_151 = arith.constant 0.000000e+00 : f32
    %226 = vector.broadcast %cst_151 : f32 to vector<8x32xf32>
    %227 = arith.cmpf ogt, %225, %226 : vector<8x32xf32>
    %cst_152 = arith.constant 2.000000e-01 : f32
    %228 = vector.broadcast %cst_152 : f32 to vector<8x32xf32>
    %229 = arith.mulf %228, %225 : vector<8x32xf32>
    %230 = arith.select %227, %225, %229 : vector<8x32xi1>, vector<8x32xf32>
    %231 = arith.truncf %230 : vector<8x32xf32> to vector<8x32xbf16>
    %c2_153 = arith.constant 2 : index
    %c0_154 = arith.constant 0 : index
    %c0_155 = arith.constant 0 : index
    %232 = vector.load %arg7[%c2_153, %c0_154, %c0_155] : memref<3x32x16xbf16, #tpu.memory_space<vmem>>, vector<1x32x16xbf16>
    %233 = vector.shape_cast %232 : vector<1x32x16xbf16> to vector<32x16xbf16>
    %cst_156 = arith.constant dense<0.000000e+00> : vector<8x16xf32>
    %234 = tpu.matmul %231, %233, %cst_156 {dimension_numbers = #tpu.dot_dimension_numbers<[1], [0], [0], [1], [0, 0, 1, 1], [], []>} : vector<8x32xbf16>, vector<32x16xbf16>, vector<8x16xf32> -> vector<8x16xf32>
    %235 = arith.addf %160, %234 : vector<8x16xf32>
    %c2_157 = arith.constant 2 : index
    %c0_158 = arith.constant 0 : index
    %236 = vector.load %arg8[%c2_157, %c0_158] : memref<3x16xf32, #tpu.memory_space<vmem>>, vector<1x16xf32>
    %237 = vector.shape_cast %236 : vector<1x16xf32> to vector<16xf32>
    %238 = vector.shape_cast %237 : vector<16xf32> to vector<1x16xf32>
    %239 = vector.broadcast %238 : vector<1x16xf32> to vector<8x16xf32>
    %240 = arith.addf %235, %239 : vector<8x16xf32>
    %c0_159 = arith.constant 0 : index
    %c0_160 = arith.constant 0 : index
    %241 = vector.load %arg2[%c0_159, %c0_160] : memref<1x16xf32, #tpu.memory_space<vmem>>, vector<1x16xf32>
    %242 = vector.broadcast %241 : vector<1x16xf32> to vector<8x16xf32>
    %243 = arith.mulf %242, %240 : vector<8x16xf32>
    %244 = math.absf %243 : vector<8x16xf32>
    %cst_161 = arith.constant 0.000000e+00 : f32
    %245 = vector.broadcast %cst_161 : f32 to vector<8x16xf32>
    %246 = arith.subf %245, %244 : vector<8x16xf32>
    %cst_162 = arith.constant 0.000000e+00 : f32
    %247 = vector.broadcast %cst_162 : f32 to vector<8x16xf32>
    %248 = arith.maximumf %246, %247 : vector<8x16xf32>
    %249 = vector.broadcast %cst_162 : f32 to vector<8x16xf32>
    %250 = arith.subf %246, %249 : vector<8x16xf32>
    %251 = arith.cmpf one, %250, %250 : vector<8x16xf32>
    %252 = vector.broadcast %cst_162 : f32 to vector<8x16xf32>
    %253 = arith.addf %246, %252 : vector<8x16xf32>
    %254 = math.absf %250 : vector<8x16xf32>
    %cst_163 = arith.constant 0.000000e+00 : f32
    %255 = vector.broadcast %cst_163 : f32 to vector<8x16xf32>
    %256 = arith.subf %255, %254 : vector<8x16xf32>
    %257 = math.exp %256 : vector<8x16xf32>
    %258 = math.log1p %257 : vector<8x16xf32>
    %259 = arith.addf %248, %258 : vector<8x16xf32>
    %260 = arith.select %251, %253, %259 : vector<8x16xi1>, vector<8x16xf32>
    %cst_164 = arith.constant 2.000000e+00 : f32
    %261 = vector.broadcast %cst_164 : f32 to vector<8x16xf32>
    %262 = arith.mulf %261, %260 : vector<8x16xf32>
    %263 = arith.addf %244, %262 : vector<8x16xf32>
    %cst_165 = arith.constant 0.000000e+00 : f32
    %264 = vector.broadcast %cst_165 : f32 to vector<8x16xf32>
    %265 = arith.subf %264, %263 : vector<8x16xf32>
    %c0_166 = arith.constant 0 : index
    %c0_167 = arith.constant 0 : index
    %266 = vector.load %arg9[%c0_166, %c0_167] : memref<8x16xf32, #tpu.memory_space<vmem>>, vector<8x16xf32>
    tpu.vector_store %arg9[%c0_166, %c0_167], %243 {strides = array<i32>} : memref<8x16xf32, #tpu.memory_space<vmem>>, vector<8x16xf32>,
    %cst_168 = arith.constant dense<0.000000e+00> : vector<8xf32>
    %267 = vector.multi_reduction <add>, %265, %cst_168 [1] : vector<8x16xf32> to vector<8xf32>
    %268 = vector.shape_cast %267 : vector<8xf32> to vector<8x1xf32>
    %c0_169 = arith.constant 0 : index
    %c0_170 = arith.constant 0 : index
    %269 = vector.load %arg10[%c0_169, %c0_170] : memref<8x1xf32, #tpu.memory_space<vmem>>, vector<8x1xf32>
    tpu.vector_store %arg10[%c0_169, %c0_170], %268 {strides = array<i32>} : memref<8x1xf32, #tpu.memory_space<vmem>>, vector<8x1xf32>,
    return
  }
  func.func @transform_0(%arg0: i32) -> (i32, i32) {
    %c0_i32 = arith.constant 0 : i32
    %c0_i32_0 = arith.constant 0 : i32
    return %arg0, %c0_i32 : i32, i32
  }
  func.func @transform_1(%arg0: i32) -> (i32, i32) {
    %c0_i32 = arith.constant 0 : i32
    %c0_i32_0 = arith.constant 0 : i32
    %c0_i32_1 = arith.constant 0 : i32
    return %c0_i32, %c0_i32_0 : i32, i32
  }
  func.func @transform_2(%arg0: i32) -> (i32, i32, i32) {
    %c0_i32 = arith.constant 0 : i32
    %c0_i32_0 = arith.constant 0 : i32
    %c0_i32_1 = arith.constant 0 : i32
    %c0_i32_2 = arith.constant 0 : i32
    return %c0_i32, %c0_i32_0, %c0_i32_1 : i32, i32, i32
  }
  func.func @transform_3(%arg0: i32) -> (i32, i32) {
    %c0_i32 = arith.constant 0 : i32
    %c0_i32_0 = arith.constant 0 : i32
    %c0_i32_1 = arith.constant 0 : i32
    return %c0_i32, %c0_i32_0 : i32, i32
  }
  func.func @transform_4(%arg0: i32) -> (i32, i32, i32, i32) {
    %c0_i32 = arith.constant 0 : i32
    %c0_i32_0 = arith.constant 0 : i32
    %c0_i32_1 = arith.constant 0 : i32
    %c0_i32_2 = arith.constant 0 : i32
    %c0_i32_3 = arith.constant 0 : i32
    return %c0_i32, %c0_i32_0, %c0_i32_1, %c0_i32_2 : i32, i32, i32, i32
  }
  func.func @transform_5(%arg0: i32) -> (i32, i32, i32) {
    %c0_i32 = arith.constant 0 : i32
    %c0_i32_0 = arith.constant 0 : i32
    %c0_i32_1 = arith.constant 0 : i32
    %c0_i32_2 = arith.constant 0 : i32
    return %c0_i32, %c0_i32_0, %c0_i32_1 : i32, i32, i32
  }
  func.func @transform_6(%arg0: i32) -> (i32, i32, i32) {
    %c0_i32 = arith.constant 0 : i32
    %c0_i32_0 = arith.constant 0 : i32
    %c0_i32_1 = arith.constant 0 : i32
    %c0_i32_2 = arith.constant 0 : i32
    return %c0_i32, %c0_i32_0, %c0_i32_1 : i32, i32, i32
  }
  func.func @transform_7(%arg0: i32) -> (i32, i32) {
    %c0_i32 = arith.constant 0 : i32
    %c0_i32_0 = arith.constant 0 : i32
    %c0_i32_1 = arith.constant 0 : i32
    return %c0_i32, %c0_i32_0 : i32, i32
  }
  func.func @transform_8(%arg0: i32) -> (i32, i32) {
    %c0_i32 = arith.constant 0 : i32
    %c0_i32_0 = arith.constant 0 : i32
    return %arg0, %c0_i32 : i32, i32
  }
  func.func @transform_9(%arg0: i32) -> (i32, i32) {
    %c0_i32 = arith.constant 0 : i32
    %c0_i32_0 = arith.constant 0 : i32
    return %arg0, %c0_i32 : i32, i32
  }
}

</mosaic_0001>

<bundles_post_ra>
// kernel: nice_forward.1
= control target key start
LH: loop header
LB: loop body
LE: loop exit
PB: predicated region body
PF: predicated region fallthrough
CT: control target
= control target key end

     0   :  { %vm45_vm0 = vcmask 130048   ;;  %s1312_s0 = inlined_call_operand.vmem [shape: f32[8,16], index: 0, kind: input, shape index: {}]   ;;  %s1313_s1 = inlined_call_operand.vmem [shape: f32[1,16], index: 1, kind: input, shape index: {}]   ;;  %s1314_s2 = inlined_call_operand.vmem [shape: bf16[3,16,32], index: 2, kind: input, shape index: {}]   ;;  %s1315_s3 = inlined_call_operand.vmem [shape: f32[3,32], index: 3, kind: input, shape index: {}]   ;;  %s1316_s4 = inlined_call_operand.vmem [shape: bf16[3,4,32,32], index: 4, kind: input, shape index: {}]   ;;  %s1317_s5 = inlined_call_operand.vmem [shape: f32[3,4,32], index: 5, kind: input, shape index: {}]   ;;  %s1318_s6 = inlined_call_operand.vmem [shape: bf16[3,32,16], index: 6, kind: input, shape index: {}]   ;;  %s1319_s7 = inlined_call_operand.vmem [shape: f32[3,16], index: 7, kind: input, shape index: {}]   ;;  %s1320_s8 = inlined_call_operand.hbm [shape: f32[8,16], index: 8, kind: output, shape index: {0}]   ;;  %s1321_s9 = inlined_call_operand.vmem [shape: f32[8,1], index: 9, kind: output, shape index: {1}]  }
   0x1   :  { %v978_v0 = vld [vmem:[%s1314_s2] sm:$0xff] }
   0x2   :  { %v1118_v1 = vld [vmem:[%s1312_s0] sm:$0xff]  ;;  %56 = vmatpush.bf16.msra.mxu0 %v978_v0 }
   0x3   :  { %v34_v2 = vpack.c.bf16 %v1118_v1, %v1118_v1 }
   0x5   :  { %768 = vmatmul.msk.bf16.vlgmr.msra.gmra.mxu0 %vm45_vm0, %v34_v2 }
   0x6   :  { %15 = vsyncpa [#allocation3], 0  ;;  %v980_v3 = vld [vmem:[%s1316_s4 + $0x8] sm:$0xff]  ;;  %v979_v4 = vld [vmem:[%s1316_s4] sm:$0xff]  ;;  %vm84_vm2 = vcmask 261120   ;;  %s751_s22 = sshll.u32 %s1320_s8, 4  ;;  %s752_s22 = int_to_ptr.hbm [resolvable:$true] %s751_s22 }
   0x7   :  { %94 = vmatpush.bf16.msra.mxu1 %v980_v3  ;;  %v1012_v5 = vld [vmem:[%s1315_s3] ss:$0 sm:$0xff]  ;;  %v982_v12 = vld [vmem:[%s1316_s4 + $0x18] sm:$0xff]  ;;  %v981_v13 = vld [vmem:[%s1316_s4 + $0x10] sm:$0xff] }
   0x8   :  { %133 = vmatpush.bf16.msra.mxu2 %v982_v12  ;;  %v1013_v14 = vld [vmem:[%s1317_s5] ss:$0 sm:$0xff]  ;;  %v984_v21 = vld [vmem:[%s1316_s4 + $0x28] sm:$0xff]  ;;  %v986_v23 = vld [vmem:[%s1316_s4 + $0x38] sm:$0xff] }
   0x9   :  { %172 = vmatpush.bf16.msra.mxu3 %v984_v21  ;;  %v983_v22 = vld [vmem:[%s1316_s4 + $0x20] sm:$0xff]  ;;  %211 = vmatpush.bf16.msrb.mxu0 %v986_v23  ;;  %v985_v31 = vld [vmem:[%s1316_s4 + $0x30] sm:$0xff]  ;;  %v988_v32 = vld [vmem:[%s1318_s6 + $0x8] sm:$0xff] }
   0xa   :  { %v1014_v24 = vld [vmem:[%s1317_s5 + $0x1] ss:$0 sm:$0xff]  ;;  %v1015_v33 = vld [vmem:[%s1317_s5 + $0x2] ss:$0 sm:$0xff]  ;;  %v989_v41 = vld [vmem:[%s1314_s2 + $0x8] sm:$0xff] }
   0xb   :  { %95 = vmatpush.bf16.msra.mxu1 %v979_v4  ;;  %v987_v40 = vld [vmem:[%s1318_s6] sm:$0xff]  ;;  %v991_v49 = vld [vmem:[%s1316_s4 + $0x48] sm:$0xff]  ;;  %v993_v57 = vld [vmem:[%s1316_s4 + $0x58] sm:$0xff] }
   0xc   :  { %134 = vmatpush.bf16.msra.mxu2 %v981_v13  ;;  %v1016_v42 = vld [vmem:[%s1317_s5 + $0x3] ss:$0 sm:$0xff]  ;;  %v1017_v50 = vld [vmem:[%s1319_s7] ss:$0 sm:$0xff]  ;;  %v1018_v58 = vld [vmem:[%s1315_s3 + $0x1] ss:$0 sm:$0xff] }
   0xd   :  { %173 = vmatpush.bf16.msra.mxu3 %v983_v22  ;;  %212 = vmatpush.bf16.msrb.mxu0 %v985_v31  ;;  %v990_v56 = vld [vmem:[%s1316_s4 + $0x40] sm:$0xff]  ;;  %v995_v2 = vld [vmem:[%s1316_s4 + $0x68] sm:$0xff] }
   0xe   :  { %v1019_v3 = vld [vmem:[%s1317_s5 + $0x4] ss:$0 sm:$0xff]  ;;  %v1020_v12 = vld [vmem:[%s1317_s5 + $0x5] ss:$0 sm:$0xff]  ;;  %v1021_v21 = vld [vmem:[%s1317_s5 + $0x6] ss:$0 sm:$0xff] }
   0xf   :  { %247 = vmatpush.bf16.msrb.mxu1 %v988_v32 }
  0x10   :  { %280 = vmatpush.bf16.msrb.mxu2 %v989_v41 }
  0x11   :  { %319 = vmatpush.bf16.msrb.mxu3 %v991_v49  ;;  %358 = vmatpush.bf16.msra.mxu0 %v993_v57 }
  0x13   :  { %248 = vmatpush.bf16.msrb.mxu1 %v987_v40 }
  0x15   :  { %320 = vmatpush.bf16.msrb.mxu3 %v990_v56 }
  0x82   :  { %v58_v6 = vpop.f32.mrf.mxu0 }
  0x83   :  { %v59_v7 = vadd.f32 %v1012_v5, %v58_v6 }
  0x85   :  { %vm62_vm1 = vcmp.gt.f32.partialorder %v59_v7, 0.0  ;;  %v63_v8 = vmul.f32 0.2, %v59_v7 }
  0x87   :  { %v64_v9 = vsel %vm62_vm1, %v59_v7, %v63_v8 }
  0x88   :  { %v65_v10 = vpack.c.bf16 %v64_v9, %v64_v9 }
  0x8a   :  { %v60_v11 = vpop.f32.mrf.mxu0  ;;  %777 = vmatmul.msk.bf16.vlgmr.msra.gmra.mxu1 %vm84_vm2, %v65_v10  ;;  %v994_v10 = vld [vmem:[%s1316_s4 + $0x60] sm:$0xff] }
  0x8b   :  { %397 = vmatpush.bf16.msra.mxu1 %v995_v2  ;;  %v997_v11 = vld [vmem:[%s1316_s4 + $0x78] sm:$0xff] }
  0x8f   :  { %398 = vmatpush.bf16.msra.mxu1 %v994_v10 }
 0x107   :  { %v97_v15 = vpop.f32.mrf.mxu1 }
 0x108   :  { %v98_v16 = vadd.f32 %v1013_v14, %v97_v15 }
 0x10a   :  { %vm101_vm3 = vcmp.gt.f32.partialorder %v98_v16, 0.0  ;;  %v102_v17 = vmul.f32 0.2, %v98_v16 }
 0x10c   :  { %v103_v18 = vsel %vm101_vm3, %v98_v16, %v102_v17 }
 0x10d   :  { %v104_v19 = vpack.c.bf16 %v103_v18, %v103_v18 }
 0x10f   :  { %v99_v20 = vpop.f32.mrf.mxu1  ;;  %790 = vmatmul.msk.bf16.vlgmr.msra.gmra.mxu2 %vm84_vm2, %v104_v19  ;;  %v996_v19 = vld [vmem:[%s1316_s4 + $0x70] sm:$0xff] }
 0x110   :  { %436 = vmatpush.bf16.msra.mxu2 %v997_v11  ;;  %v999_v20 = vld [vmem:[%s1318_s6 + $0x18] sm:$0xff] }
 0x114   :  { %437 = vmatpush.bf16.msra.mxu2 %v996_v19 }
 0x192   :  { %v136_v25 = vpop.f32.mrf.mxu2 }
 0x193   :  { %v137_v26 = vadd.f32 %v1014_v24, %v136_v25 }
 0x195   :  { %vm140_vm4 = vcmp.gt.f32.partialorder %v137_v26, 0.0  ;;  %v141_v27 = vmul.f32 0.2, %v137_v26 }
 0x197   :  { %v142_v28 = vsel %vm140_vm4, %v137_v26, %v141_v27  ;;  %vm742_vm4 = vcmask 7168  }
 0x198   :  { %v143_v29 = vpack.c.bf16 %v142_v28, %v142_v28  ;;  %v998_v28 = vld [vmem:[%s1318_s6 + $0x10] sm:$0xff] }
 0x19a   :  { %v138_v30 = vpop.f32.mrf.mxu2  ;;  %803 = vmatmul.msk.bf16.vlgmr.msra.gmra.mxu3 %vm84_vm2, %v143_v29  ;;  %v1000_v29 = vld [vmem:[%s1314_s2 + $0x10] sm:$0xff] }
 0x19b   :  { %473 = vmatpush.bf16.msra.mxu3 %v999_v20  ;;  %v1022_v30 = vld [vmem:[%s1317_s5 + $0x7] ss:$0 sm:$0xff] }
 0x19f   :  { %474 = vmatpush.bf16.msra.mxu3 %v998_v28 }
 0x21d   :  { %v175_v34 = vpop.f32.mrf.mxu3 }
 0x21e   :  { %v176_v35 = vadd.f32 %v1015_v33, %v175_v34 }
 0x220   :  { %vm179_vm5 = vcmp.gt.f32.partialorder %v176_v35, 0.0  ;;  %v180_v36 = vmul.f32 0.2, %v176_v35 }
 0x222   :  { %v181_v37 = vsel %vm179_vm5, %v176_v35, %v180_v36 }
 0x223   :  { %v182_v38 = vpack.c.bf16 %v181_v37, %v181_v37  ;;  %v1002_v37 = vld [vmem:[%s1316_s4 + $0x88] sm:$0xff] }
 0x225   :  { %v177_v39 = vpop.f32.mrf.mxu3  ;;  %816 = vmatmul.msk.bf16.vlgmr.msrb.gmra.mxu0 %vm84_vm2, %v182_v38  ;;  %v1023_v38 = vld [vmem:[%s1319_s7 + $0x1] ss:$0 sm:$0xff] }
 0x2a2   :  { %v214_v43 = vpop.f32.mrf.mxu0 }
 0x2a3   :  { %v215_v44 = vadd.f32 %v1016_v42, %v214_v43 }
 0x2a5   :  { %vm218_vm6 = vcmp.gt.f32.partialorder %v215_v44, 0.0  ;;  %v219_v45 = vmul.f32 0.2, %v215_v44 }
 0x2a7   :  { %v220_v46 = vsel %vm218_vm6, %v215_v44, %v219_v45  ;;  %v1001_v44 = vld [vmem:[%s1316_s4 + $0x80] sm:$0xff]  ;;  %v1004_v45 = vld [vmem:[%s1316_s4 + $0x98] sm:$0xff] }
 0x2a8   :  { %v221_v47 = vpack.c.bf16 %v220_v46, %v220_v46  ;;  %v1024_v46 = vld [vmem:[%s1315_s3 + $0x2] ss:$0 sm:$0xff] }
 0x2aa   :  { %v216_v48 = vpop.f32.mrf.mxu0  ;;  %825 = vmatmul.msk.bf16.vlgmr.msrb.gmra.mxu1 %vm84_vm2, %v221_v47 }
 0x2ab   :  { %545 = vmatpush.bf16.msrb.mxu1 %v1002_v37 }
 0x2af   :  { %546 = vmatpush.bf16.msrb.mxu1 %v1001_v44 }
 0x327   :  { %v250_v51 = vpop.f32.mrf.mxu1 }
 0x328   :  { %v254_v52 = vadd.f32 %v250_v51, %v1118_v1  ;;  %v992_v1 = vld [vmem:[%s1316_s4 + $0x50] sm:$0xff] }
 0x329   :  { %359 = vmatpush.bf16.msra.mxu0 %v992_v1 }
 0x32a   :  { %v1183_v53 = vadd.f32 %v1017_v50, %v254_v52 }
 0x32c   :  { %v258_v54 = vpack.c.bf16 %v1183_v53, %v1183_v53 }
 0x32d   :  { %506 = vmatpush.bf16.msrb.mxu0 %v1000_v29 }
 0x32e   :  { %832 = vmatmul.msk.bf16.vlgmr.msrb.gmra.mxu2 %vm45_vm0, %v258_v54  ;;  %v1006_v54 = vld [vmem:[%s1316_s4 + $0xa8] sm:$0xff] }
 0x32f   :  { %v252_v55 = vpop.f32.mrf.mxu1  ;;  %584 = vmatpush.bf16.msrb.mxu2 %v1004_v45 }
 0x330   :  { %v1025_v55 = vld [vmem:[%s1317_s5 + $0x8] ss:$0 sm:$0xff] }
 0x3b1   :  { %v282_v59 = vpop.f32.mrf.mxu2 }
 0x3b2   :  { %v283_v60 = vadd.f32 %v1018_v58, %v282_v59 }
 0x3b4   :  { %vm286_vm7 = vcmp.gt.f32.partialorder %v283_v60, 0.0  ;;  %v287_v61 = vmul.f32 0.2, %v283_v60 }
 0x3b6   :  { %v288_v62 = vsel %vm286_vm7, %v283_v60, %v287_v61 }
 0x3b7   :  { %v289_v63 = vpack.c.bf16 %v288_v62, %v288_v62  ;;  %v1005_v62 = vld [vmem:[%s1316_s4 + $0xa0] sm:$0xff] }
 0x3b9   :  { %v284_v0 = vpop.f32.mrf.mxu2  ;;  %846 = vmatmul.msk.bf16.vlgmr.msrb.gmra.mxu3 %vm84_vm2, %v289_v63  ;;  %v1008_v63 = vld [vmem:[%s1316_s4 + $0xb8] sm:$0xff] }
 0x3ba   :  { %623 = vmatpush.bf16.msrb.mxu3 %v1006_v54  ;;  %v1026_v0 = vld [vmem:[%s1317_s5 + $0x9] ss:$0 sm:$0xff] }
 0x3be   :  { %624 = vmatpush.bf16.msrb.mxu3 %v1005_v62 }
 0x43c   :  { %v322_v4 = vpop.f32.mrf.mxu3 }
 0x43d   :  { %v323_v5 = vadd.f32 %v1019_v3, %v322_v4 }
 0x43f   :  { %vm326_vm8 = vcmp.gt.f32.partialorder %v323_v5, 0.0  ;;  %v327_v6 = vmul.f32 0.2, %v323_v5 }
 0x441   :  { %v328_v7 = vsel %vm326_vm8, %v323_v5, %v327_v6 }
 0x442   :  { %v329_v8 = vpack.c.bf16 %v328_v7, %v328_v7  ;;  %v1007_v7 = vld [vmem:[%s1316_s4 + $0xb0] sm:$0xff] }
 0x444   :  { %v324_v9 = vpop.f32.mrf.mxu3  ;;  %860 = vmatmul.msk.bf16.vlgmr.msra.gmra.mxu0 %vm84_vm2, %v329_v8  ;;  %v1010_v8 = vld [vmem:[%s1318_s6 + $0x28] sm:$0xff] }
 0x445   :  { %662 = vmatpush.bf16.msra.mxu0 %v1008_v63  ;;  %v1027_v9 = vld [vmem:[%s1317_s5 + $0xa] ss:$0 sm:$0xff] }
 0x449   :  { %663 = vmatpush.bf16.msra.mxu0 %v1007_v7 }
 0x4c1   :  { %v361_v13 = vpop.f32.mrf.mxu0 }
 0x4c2   :  { %v362_v14 = vadd.f32 %v1020_v12, %v361_v13 }
 0x4c4   :  { %vm365_vm9 = vcmp.gt.f32.partialorder %v362_v14, 0.0  ;;  %v366_v15 = vmul.f32 0.2, %v362_v14 }
 0x4c6   :  { %v367_v16 = vsel %vm365_vm9, %v362_v14, %v366_v15 }
 0x4c7   :  { %v368_v17 = vpack.c.bf16 %v367_v16, %v367_v16  ;;  %v1009_v16 = vld [vmem:[%s1318_s6 + $0x20] sm:$0xff] }
 0x4c9   :  { %v363_v18 = vpop.f32.mrf.mxu0  ;;  %874 = vmatmul.msk.bf16.vlgmr.msra.gmra.mxu1 %vm84_vm2, %v368_v17  ;;  %v1028_v17 = vld [vmem:[%s1317_s5 + $0xb] ss:$0 sm:$0xff]  ;;  %s1061_s5 = smov [#allocation2]  }
 0x4ca   :  { %699 = vmatpush.bf16.msra.mxu1 %v1010_v8 }
 0x4ce   :  { %700 = vmatpush.bf16.msra.mxu1 %v1009_v16 }
 0x546   :  { %v400_v22 = vpop.f32.mrf.mxu1 }
 0x547   :  { %v401_v23 = vadd.f32 %v1021_v21, %v400_v22 }
 0x549   :  { %vm404_vm10 = vcmp.gt.f32.partialorder %v401_v23, 0.0  ;;  %v405_v24 = vmul.f32 0.2, %v401_v23 }
 0x54b   :  { %v406_v25 = vsel %vm404_vm10, %v401_v23, %v405_v24  ;;  %v1029_v24 = vld [vmem:[%s1319_s7 + $0x2] ss:$0 sm:$0xff] }
 0x54c   :  { %v407_v26 = vpack.c.bf16 %v406_v25, %v406_v25 }
 0x54e   :  { %v402_v27 = vpop.f32.mrf.mxu1  ;;  %888 = vmatmul.msk.bf16.vlgmr.msra.gmra.mxu2 %vm84_vm2, %v407_v26 }
 0x54f   :  { %v1030_v27 = vld [vmem:[%s1313_s1] ss:$0 sm:$0xff]  ;;  %s749_s1 = sshll.u32 %s1061_s5, 4  ;;  %s750_s1 = int_to_ptr.vmem [resolvable:$true] %s749_s1 }
 0x5d1   :  { %v439_v31 = vpop.f32.mrf.mxu2 }
 0x5d2   :  { %v440_v32 = vadd.f32 %v1022_v30, %v439_v31 }
 0x5d4   :  { %vm443_vm11 = vcmp.gt.f32.partialorder %v440_v32, 0.0  ;;  %v444_v33 = vmul.f32 0.2, %v440_v32 }
 0x5d6   :  { %v445_v34 = vsel %vm443_vm11, %v440_v32, %v444_v33 }
 0x5d7   :  { %v446_v35 = vpack.c.bf16 %v445_v34, %v445_v34 }
 0x5d9   :  { %v441_v36 = vpop.f32.mrf.mxu2  ;;  %901 = vmatmul.msk.bf16.vlgmr.msra.gmra.mxu3 %vm84_vm2, %v446_v35 }
 0x65c   :  { %v476_v39 = vpop.f32.mrf.mxu3 }
 0x65d   :  { %v480_v40 = vadd.f32 %v476_v39, %v1183_v53  ;;  %v1003_v53 = vld [vmem:[%s1316_s4 + $0x90] sm:$0xff] }
 0x65e   :  { %585 = vmatpush.bf16.msrb.mxu2 %v1003_v53 }
 0x65f   :  { %v1245_v41 = vadd.f32 %v1023_v38, %v480_v40 }
 0x661   :  { %v484_v42 = vpack.c.bf16 %v1245_v41, %v1245_v41 }
 0x663   :  { %908 = vmatmul.msk.bf16.vlgmr.msrb.gmra.mxu0 %vm45_vm0, %v484_v42 }
 0x664   :  { %v478_v43 = vpop.f32.mrf.mxu3 }
 0x6e0   :  { %v508_v47 = vpop.f32.mrf.mxu0 }
 0x6e1   :  { %v509_v48 = vadd.f32 %v1024_v46, %v508_v47 }
 0x6e3   :  { %vm512_vm12 = vcmp.gt.f32.partialorder %v509_v48, 0.0  ;;  %v513_v49 = vmul.f32 0.2, %v509_v48 }
 0x6e5   :  { %v514_v50 = vsel %vm512_vm12, %v509_v48, %v513_v49 }
 0x6e6   :  { %v515_v51 = vpack.c.bf16 %v514_v50, %v514_v50 }
 0x6e8   :  { %v510_v52 = vpop.f32.mrf.mxu0  ;;  %922 = vmatmul.msk.bf16.vlgmr.msrb.gmra.mxu1 %vm84_vm2, %v515_v51 }
 0x765   :  { %v548_v56 = vpop.f32.mrf.mxu1 }
 0x766   :  { %v549_v57 = vadd.f32 %v1025_v55, %v548_v56 }
 0x768   :  { %vm552_vm13 = vcmp.gt.f32.partialorder %v549_v57, 0.0  ;;  %v553_v58 = vmul.f32 0.2, %v549_v57 }
 0x76a   :  { %v554_v59 = vsel %vm552_vm13, %v549_v57, %v553_v58 }
 0x76b   :  { %v555_v60 = vpack.c.bf16 %v554_v59, %v554_v59 }
 0x76d   :  { %v550_v61 = vpop.f32.mrf.mxu1  ;;  %936 = vmatmul.msk.bf16.vlgmr.msrb.gmra.mxu2 %vm84_vm2, %v555_v60 }
 0x7f0   :  { %v587_v1 = vpop.f32.mrf.mxu2 }
 0x7f1   :  { %v588_v2 = vadd.f32 %v1026_v0, %v587_v1 }
 0x7f3   :  { %vm591_vm14 = vcmp.gt.f32.partialorder %v588_v2, 0.0  ;;  %v592_v3 = vmul.f32 0.2, %v588_v2 }
 0x7f5   :  { %v593_v4 = vsel %vm591_vm14, %v588_v2, %v592_v3 }
 0x7f6   :  { %v594_v5 = vpack.c.bf16 %v593_v4, %v593_v4 }
 0x7f8   :  { %v589_v6 = vpop.f32.mrf.mxu2  ;;  %950 = vmatmul.msk.bf16.vlgmr.msrb.gmra.mxu3 %vm84_vm2, %v594_v5 }
 0x87b   :  { %v626_v10 = vpop.f32.mrf.mxu3 }
 0x87c   :  { %v627_v11 = vadd.f32 %v1027_v9, %v626_v10 }
 0x87e   :  { %vm630_vm15 = vcmp.gt.f32.partialorder %v627_v11, 0.0  ;;  %v631_v12 = vmul.f32 0.2, %v627_v11 }
 0x880   :  { %v632_v13 = vsel %vm630_vm15, %v627_v11, %v631_v12 }
 0x881   :  { %v633_v14 = vpack.c.bf16 %v632_v13, %v632_v13 }
 0x883   :  { %v628_v15 = vpop.f32.mrf.mxu3  ;;  %964 = vmatmul.msk.bf16.vlgmr.msra.gmra.mxu0 %vm84_vm2, %v633_v14 }
 0x900   :  { %v665_v18 = vpop.f32.mrf.mxu0 }
 0x901   :  { %v666_v19 = vadd.f32 %v1028_v17, %v665_v18 }
 0x903   :  { %vm669_vm1 = vcmp.gt.f32.partialorder %v666_v19, 0.0  ;;  %v670_v20 = vmul.f32 0.2, %v666_v19 }
 0x905   :  { %v671_v21 = vsel %vm669_vm1, %v666_v19, %v670_v20 }
 0x906   :  { %v672_v22 = vpack.c.bf16 %v671_v21, %v671_v21 }
 0x908   :  { %v667_v23 = vpop.f32.mrf.mxu0  ;;  %977 = vmatmul.msk.bf16.vlgmr.msra.gmra.mxu1 %vm84_vm2, %v672_v22 }
 0x985   :  { %v702_v25 = vpop.f32.mrf.mxu1 }
 0x986   :  { %v706_v26 = vadd.f32 %v702_v25, %v1245_v41 }
 0x988   :  { %v709_v28 = vadd.f32 %v1029_v24, %v706_v26 }
 0x98a   :  { %v714_v29 = vmul.f32 %v1030_v27, %v709_v28 }
 0x98c   :  { %738 = vst.msk [vmem:[#allocation2] sm:$0xff] %vm45_vm0, %v714_v29  ;;  %v715_v30 = vand.u32 2147483647, %v714_v29 }
 0x98d   :  { %v704_v31 = vpop.f32.mrf.mxu1  ;;  %754 = dma.vmem_to_hbm [thread:$0]  %s750_s1, 128, %s752_s22, [#allocation3]  }
 0x98e   :  { %v716_v32 = vsub.f32 0.0, %v715_v30 }
 0x990   :  { %v720_v33 = vand.u32 2147483647, %v716_v32  ;;  %v717_v44 = vmax.f32 %v716_v32, 0.0  ;;  %vm718_vm3 = vcmp.ne.f32.partialorder %v716_v32, %v716_v32 }
 0x992   :  { %v721_v34 = vsub.f32 0.0, %v720_v33 }
 0x994   :  { %v722_v35 = vmul.f32 1.442695, %v721_v34 }
 0x996   :  { %1031 = vpow2.f32 %v722_v35 }
 0x99c   :  { %v1032_v36 = vpop.eup %1031 }
 0x99d   :  { %v724_v37 = vadd.f32 1.0, %v1032_v36  ;;  %v727_v38 = vmul.f32 -0.5, %v1032_v36  ;;  %v730_v40 = vand.u32 2147483647, %v1032_v36 }
 0x99f   :  { %1033 = vlog2.f32 %v724_v37  ;;  %v728_v39 = vadd.f32 1.0, %v727_v38  ;;  %vm731_vm2 = vcmp.lt.f32.partialorder %v730_v40, 0.0004427343 }
 0x9a1   :  { %v729_v43 = vmul.f32 %v1032_v36, %v728_v39 }
 0x9a5   :  { %v1034_v41 = vpop.eup %1033 }
 0x9a6   :  { %v726_v42 = vmul.f32 0.6931472, %v1034_v41 }
 0x9a8   :  { %v732_v45 = vsel %vm731_vm2, %v729_v43, %v726_v42 }
 0x9a9   :  { %v733_v46 = vadd.f32 %v732_v45, %v717_v44 }
 0x9ab   :  { %v734_v47 = vsel %vm718_vm3, %v716_v32, %v733_v46 }
 0x9ac   :  { %v735_v48 = vmul.f32 2.0, %v734_v47 }
 0x9ae   :  { %v736_v49 = vadd.f32 %v735_v48, %v715_v30 }
 0x9b0   :  { %v737_v50 = vsub.f32 0.0, %v736_v49 }
 0x9b2   :  { %v739_v51 = vsel %vm45_vm0, %v737_v50, 0.0 }
 0x9b3   :  { %740 = vadd.xlane.f32.xlu0 %v739_v51 }
 0xa26   :  { %v741_v52 = vpop.xlane.xlu0 %740 }
 0xa27   :  { %743 = vst.msk [vmem:[%s1321_s9] sm:$0xff] %vm742_vm4, %v741_v52 }
 0xa28   :  { %1059 = dma.done.wait [#allocation3], 128  }
 0xa29   :  { %1060 = vsyncadd [#allocation3], 4294967168 }
 0xa2a   :  { %763 = vsyncpa [#allocation3], 1 }

</bundles_post_ra>
